<compile_context>
chip_gen: v5e
topology: v5e:2x2
jax: 0.10.0
libtpu: 0.0.40
codegen_flags: <defaults>
</compile_context>

<pallas_src>
import functools

import jax
import jax.numpy as jnp
from jax import lax
from jax.experimental import pallas as pl
from jax.experimental.pallas import tpu as pltpu

_EPS = 1e-12  # F.normalize eps


# ---------------------------------------------------------------------------
# Sizing helpers (padded-VMEM aware, per-generation budget)
# ---------------------------------------------------------------------------
def _round_up(x, m):
    return ((x + m - 1) // m) * m


def _vmem_capacity_bytes():
    try:
        return int(pltpu.get_tpu_info().vmem_capacity_bytes)
    except Exception:
        return 64 * 1024 * 1024  # v7x per-TC physical VMEM (most restrictive)


def _pick_batch_tile(b, n_neg, d, two_b, budget_bytes):
    """Largest multiple of 8 dividing b whose PADDED VMEM footprint fits.

    Accounts for lane padding (last dim -> 128), sublane padding
    (second-minor -> 8 for f32), x2 double-buffering of pipelined inputs,
    the grid-resident entity table, and in-kernel one-hot/gather temporaries.
    Prefers >= 2 (even) grid steps so v7x megacore can split the axis.
    """
    d_pad = _round_up(d, 128) * 4           # bytes per padded D-row
    n_pad = _round_up(n_neg, 128) * 4       # bytes per padded idx-row (N in lanes)
    oh_pad = _round_up(two_b, 128) * 4      # bytes per padded one-hot row
    table_bytes = 2 * _round_up(two_b, 8) * _round_up(d, 128) * 4  # resident, 2 bufs

    def footprint(t):
        pipelined = 2 * (t * d_pad + 2 * t * n_pad)   # rels + 2 idx blocks, double-buffered
        live_temps = t * (2 * oh_pad + 8 * d_pad)     # one-hot pair + h/t/r/nh/nt/acc rows
        return table_bytes + pipelined + live_temps

    cands = [t for t in range(8, b + 1, 8)
             if b % t == 0 and footprint(t) <= budget_bytes]
    if not cands:
        return b
    even = [t for t in cands if (b // t) % 2 == 0]
    if even:
        return even[-1]
    multi = [t for t in cands if b // t >= 2]
    return multi[-1] if multi else cands[-1]


# ---------------------------------------------------------------------------
# Fused kernel: gather (one-hot MXU) + normalize + TransE margin partials
# ---------------------------------------------------------------------------
def _loss_kernel(tbl_ref, rel_ref, nhi_ref, nti_ref, o_ref):
    tb = rel_ref.shape[0]
    two_b = tbl_ref.shape[0]
    i = pl.program_id(0)

    tbl = tbl_ref[...]         # (2B, D) raw entity table (VMEM-resident)
    r = rel_ref[...]           # (tb, D) relation embeddings
    nh_idx = nhi_ref[...]      # (tb, N) int32 negative-head row ids
    nt_idx = nti_ref[...]      # (tb, N) int32 negative-tail row ids
    n_neg = nh_idx.shape[1]

    col = lax.broadcasted_iota(jnp.int32, (tb, two_b), 1)

    def gather_norm(idx_col):  # idx_col: (tb, 1) int32 row ids into tbl
        onehot = (idx_col == col).astype(tbl.dtype)                   # (tb, 2B)
        row = jnp.dot(onehot, tbl, preferred_element_type=jnp.float32)  # (tb, D) MXU gather
        ssq = jnp.sum(row * row, axis=-1, keepdims=True)
        # x / max(||x||, eps) == x * rsqrt(max(||x||^2, eps^2)); rsqrt on EUP.
        return row * lax.rsqrt(jnp.maximum(ssq, _EPS * _EPS))

    # Positives: rows 2*b (head) and 2*b+1 (tail) of the flattened table.
    b_ids = lax.broadcasted_iota(jnp.int32, (tb, 1), 0) + i * tb      # (tb, 1)
    h = gather_norm(2 * b_ids)
    t = gather_norm(2 * b_ids + 1)

    pos = -jnp.sum(jnp.abs(h + r - t), axis=-1, keepdims=True)        # (tb, 1)

    margin_acc = jnp.zeros((tb, 1), jnp.float32)
    for n in range(n_neg):                                            # static unroll (small N)
        nh = gather_norm(nh_idx[:, n:n + 1])
        nt = gather_norm(nt_idx[:, n:n + 1])
        neg = -jnp.sum(jnp.abs(nh + r - nt), axis=-1, keepdims=True)  # (tb, 1)
        margin_acc = margin_acc + jnp.maximum(1.0 - pos + neg, 0.0)

    margin_sum = jnp.sum(margin_acc)
    ht_sumsq = jnp.sum(h * h) + jnp.sum(t * t)
    r_sumsq = jnp.sum(r * r)

    # Lane-dense 128-wide partial row: lane0=margin, lane1=sum(h^2+t^2), lane2=sum(r^2).
    lane = lax.broadcasted_iota(jnp.int32, (1, 128), 1)
    row = jnp.where(lane == 0, margin_sum,
          jnp.where(lane == 1, ht_sumsq,
          jnp.where(lane == 2, r_sumsq, jnp.float32(0.0))))
    o_ref[...] = row.reshape(1, 1, 128)


def link_prediction_loss(ent_embs, rels, neg_idx, rel_weight,
                         regularizer=0.01, batch_tile=None):
    """JAX wrapper mirroring LinkPrediction (encode normalization + compute_loss).

    ent_embs   : (B, 2, D) float32 -- raw entity embeddings (pre-normalization)
    rels       : (B, 1)    int32   -- relation ids
    neg_idx    : (B, N, 2) int32   -- indices into ent_embs.reshape(2B, D)
    rel_weight : (num_relations, D) float32 -- rel_emb.weight
    """
    B, two, D = ent_embs.shape
    assert two == 2
    N = neg_idx.shape[1]
    two_b = 2 * B

    # XLA glue (tiny, data-dependent): relation lookup + idx split.
    ent_flat = ent_embs.reshape(two_b, D)                        # raw; normalized in-kernel
    rels_e = jnp.take(rel_weight, rels[:, 0], axis=0)            # (B, D)
    nh_idx = neg_idx[:, :, 0].astype(jnp.int32)                  # (B, N)
    nt_idx = neg_idx[:, :, 1].astype(jnp.int32)                  # (B, N)

    vmem_cap = _vmem_capacity_bytes()
    vmem_limit = int(min(vmem_cap * 3 // 4, 100 * 1024 * 1024))  # 96MiB on 128MiB parts, 48MiB on v7x
    budget = vmem_limit * 3 // 4                                 # headroom for compiler temporaries

    tb = batch_tile if batch_tile is not None else _pick_batch_tile(B, N, D, two_b, budget)
    assert B % tb == 0, (B, tb)
    num_tiles = B // tb

    partials = pl.pallas_call(
        _loss_kernel,
        out_shape=jax.ShapeDtypeStruct((num_tiles, 1, 128), jnp.float32),
        grid=(num_tiles,),
        in_specs=[
            pl.BlockSpec((two_b, D), lambda i: (0, 0)),   # entity table: VMEM-resident
            pl.BlockSpec((tb, D), lambda i: (i, 0)),      # relation embeddings
            pl.BlockSpec((tb, N), lambda i: (i, 0)),      # negative head ids
            pl.BlockSpec((tb, N), lambda i: (i, 0)),      # negative tail ids
        ],
        out_specs=pl.BlockSpec((1, 1, 128), lambda i: (i, 0, 0)),
        compiler_params=pltpu.CompilerParams(
            dimension_semantics=("parallel",),            # v7x: 2 TCs split the grid
            vmem_limit_bytes=vmem_limit,
        ),
    )(ent_flat, rels_e, nh_idx, nt_idx)

    margin_total = jnp.sum(partials[:, 0, 0])
    ht_total = jnp.sum(partials[:, 0, 1])
    r_total = jnp.sum(partials[:, 0, 2])

    model_loss = margin_total / (B * N)
    reg_loss = (regularizer / 3.0) * (ht_total + r_total) / (B * D)
    return model_loss + reg_loss


# ---------------------------------------------------------------------------
# Pure-JAX reference mirroring the PyTorch code path exactly
# ---------------------------------------------------------------------------
def _reference_loss(ent_embs, rels, neg_idx, rel_weight, regularizer=0.01):
    def normalize(x):
        n = jnp.linalg.norm(x, axis=-1, keepdims=True)
        return x / jnp.maximum(n, _EPS)

    B = ent_embs.shape[0]
    ent_n = normalize(ent_embs)                                  # encode()
    r = jnp.take(rel_weight, rels[:, 0], axis=0)[:, None, :]     # (B, 1, D)
    heads, tails = ent_n[:, :1, :], ent_n[:, 1:, :]              # (B, 1, D)
    pos = -jnp.sum(jnp.abs(heads + r - tails), axis=-1)          # (B, 1)
    ent_flat = ent_n.reshape(2 * B, -1)
    neg = ent_flat[neg_idx]                                      # (B, N, 2, D)
    nh, nt = neg[:, :, 0, :], neg[:, :, 1, :]
    negs = -jnp.sum(jnp.abs(nh + r - nt), axis=-1)               # (B, N)
    model_loss = jnp.mean(jnp.maximum(1.0 - pos + negs, 0.0))
    reg = regularizer * (jnp.mean(heads ** 2) + jnp.mean(tails ** 2)
                         + jnp.mean(r ** 2)) / 3.0
    return model_loss + reg


if __name__ == "__main__":
    B, N, DIM, NUM_REL = 16, 4, 32, 16
    REG = 0.01

    key = jax.random.PRNGKey(0)
    k1, k2, k3, k4 = jax.random.split(key, 4)

    ent_embs = jax.random.normal(k1, (B, 2, DIM), dtype=jnp.float32)
    rels = jax.random.randint(k2, (B, 1), 0, NUM_REL, dtype=jnp.int32)
    neg_idx = jax.random.randint(k3, (B, N, 2), 0, 2 * B, dtype=jnp.int32)

    # nn.Embedding(num_relations, dim) with xavier_uniform_ init.
    bound = (6.0 / (NUM_REL + DIM)) ** 0.5
    rel_weight = jax.random.uniform(k4, (NUM_REL, DIM), jnp.float32, -bound, bound)

    # Auto tile -> tb=8, grid=(2,): exercises the tiled / parallel path.
    loss_fn = jax.jit(functools.partial(link_prediction_loss, regularizer=REG))
    loss = jax.block_until_ready(loss_fn(ent_embs, rels, neg_idx, rel_weight))

    ref = jax.block_until_ready(
        _reference_loss(ent_embs, rels, neg_idx, rel_weight, REG))
    assert jnp.allclose(loss, ref, rtol=1e-4, atol=1e-5), (loss, ref)

    print("KERNEL_OK")
</pallas_src>

<mosaic_0001>
module attributes {stable_mosaic.version = 11 : i64} {
  func.func @_loss_kernel(%arg0: i32, %arg1: memref<32x32xf32, #tpu.memory_space<vmem>>, %arg2: memref<8x32xf32, #tpu.memory_space<vmem>>, %arg3: memref<8x4xi32, #tpu.memory_space<vmem>>, %arg4: memref<8x4xi32, #tpu.memory_space<vmem>>, %arg5: memref<1x1x128xf32, #tpu.memory_space<vmem>>) attributes {dimension_semantics = [#tpu.dimension_semantics<parallel>], iteration_bounds = array<i64: 2>, scalar_prefetch = 0 : i64, scratch_operands = 0 : i64, tpu.core_type = #tpu.core_type<tc>, window_params = [{pipeline_mode = #tpu.pipeline_mode<synchronous>, transform_indices = @transform_0, window_bounds = array<i64: 32, 32>}, {transform_indices = @transform_1, window_bounds = array<i64: 8, 32>}, {transform_indices = @transform_2, window_bounds = array<i64: 8, 4>}, {transform_indices = @transform_3, window_bounds = array<i64: 8, 4>}, {transform_indices = @transform_4, window_bounds = array<i64: 1, 1, 128>}]} {
    %c0 = arith.constant 0 : index
    %c0_0 = arith.constant 0 : index
    %0 = vector.load %arg1[%c0, %c0_0] : memref<32x32xf32, #tpu.memory_space<vmem>>, vector<32x32xf32>
    %c0_1 = arith.constant 0 : index
    %c0_2 = arith.constant 0 : index
    %1 = vector.load %arg2[%c0_1, %c0_2] : memref<8x32xf32, #tpu.memory_space<vmem>>, vector<8x32xf32>
    %c0_3 = arith.constant 0 : index
    %c0_4 = arith.constant 0 : index
    %2 = vector.load %arg3[%c0_3, %c0_4] : memref<8x4xi32, #tpu.memory_space<vmem>>, vector<8x4xi32>
    %c0_5 = arith.constant 0 : index
    %c0_6 = arith.constant 0 : index
    %3 = vector.load %arg4[%c0_5, %c0_6] : memref<8x4xi32, #tpu.memory_space<vmem>>, vector<8x4xi32>
    %4 = tpu.iota {dimensions = array<i32: 1>} : vector<8x32xi32>
    %5 = tpu.iota {dimensions = array<i32: 0>} : vector<8x1xi32>
    %c8_i32 = arith.constant 8 : i32
    %6 = arith.muli %arg0, %c8_i32 : i32
    %7 = vector.broadcast %6 : i32 to vector<8x1xi32>
    %8 = arith.addi %5, %7 : vector<8x1xi32>
    %c2_i32 = arith.constant 2 : i32
    %9 = vector.broadcast %c2_i32 : i32 to vector<8x1xi32>
    %10 = arith.muli %9, %8 : vector<8x1xi32>
    %11 = vector.broadcast %10 : vector<8x1xi32> to vector<8x32xi32>
    %12 = arith.cmpi eq, %11, %4 : vector<8x32xi32>
    %13 = arith.extui %12 : vector<8x32xi1> to vector<8x32xi32>
    %14 = arith.sitofp %13 : vector<8x32xi32> to vector<8x32xf32>
    %cst = arith.constant dense<0.000000e+00> : vector<8x32xf32>
    %15 = tpu.matmul %14, %0, %cst {dimension_numbers = #tpu.dot_dimension_numbers<[1], [0], [0], [1], [0, 0, 1, 1], [], []>} : vector<8x32xf32>, vector<32x32xf32>, vector<8x32xf32> -> vector<8x32xf32>
    %16 = arith.mulf %15, %15 : vector<8x32xf32>
    %cst_7 = arith.constant dense<0.000000e+00> : vector<8xf32>
    %17 = vector.multi_reduction <add>, %16, %cst_7 [1] : vector<8x32xf32> to vector<8xf32>
    %18 = vector.shape_cast %17 : vector<8xf32> to vector<8x1xf32>
    %cst_8 = arith.constant 1.000000e-24 : f32
    %19 = vector.broadcast %cst_8 : f32 to vector<8x1xf32>
    %20 = arith.maximumf %18, %19 : vector<8x1xf32>
    %21 = math.rsqrt %20 : vector<8x1xf32>
    %22 = vector.broadcast %21 : vector<8x1xf32> to vector<8x32xf32>
    %23 = arith.mulf %15, %22 : vector<8x32xf32>
    %c2_i32_9 = arith.constant 2 : i32
    %24 = vector.broadcast %c2_i32_9 : i32 to vector<8x1xi32>
    %25 = arith.muli %24, %8 : vector<8x1xi32>
    %c1_i32 = arith.constant 1 : i32
    %26 = vector.broadcast %c1_i32 : i32 to vector<8x1xi32>
    %27 = arith.addi %25, %26 : vector<8x1xi32>
    %28 = vector.broadcast %27 : vector<8x1xi32> to vector<8x32xi32>
    %29 = arith.cmpi eq, %28, %4 : vector<8x32xi32>
    %30 = arith.extui %29 : vector<8x32xi1> to vector<8x32xi32>
    %31 = arith.sitofp %30 : vector<8x32xi32> to vector<8x32xf32>
    %cst_10 = arith.constant dense<0.000000e+00> : vector<8x32xf32>
    %32 = tpu.matmul %31, %0, %cst_10 {dimension_numbers = #tpu.dot_dimension_numbers<[1], [0], [0], [1], [0, 0, 1, 1], [], []>} : vector<8x32xf32>, vector<32x32xf32>, vector<8x32xf32> -> vector<8x32xf32>
    %33 = arith.mulf %32, %32 : vector<8x32xf32>
    %cst_11 = arith.constant dense<0.000000e+00> : vector<8xf32>
    %34 = vector.multi_reduction <add>, %33, %cst_11 [1] : vector<8x32xf32> to vector<8xf32>
    %35 = vector.shape_cast %34 : vector<8xf32> to vector<8x1xf32>
    %cst_12 = arith.constant 1.000000e-24 : f32
    %36 = vector.broadcast %cst_12 : f32 to vector<8x1xf32>
    %37 = arith.maximumf %35, %36 : vector<8x1xf32>
    %38 = math.rsqrt %37 : vector<8x1xf32>
    %39 = vector.broadcast %38 : vector<8x1xf32> to vector<8x32xf32>
    %40 = arith.mulf %32, %39 : vector<8x32xf32>
    %41 = arith.addf %23, %1 : vector<8x32xf32>
    %42 = arith.subf %41, %40 : vector<8x32xf32>
    %43 = math.absf %42 : vector<8x32xf32>
    %cst_13 = arith.constant dense<0.000000e+00> : vector<8xf32>
    %44 = vector.multi_reduction <add>, %43, %cst_13 [1] : vector<8x32xf32> to vector<8xf32>
    %45 = vector.shape_cast %44 : vector<8xf32> to vector<8x1xf32>
    %cst_14 = arith.constant 0.000000e+00 : f32
    %46 = vector.broadcast %cst_14 : f32 to vector<8x1xf32>
    %47 = arith.subf %46, %45 : vector<8x1xf32>
    %cst_15 = arith.constant 0.000000e+00 : f32
    %48 = vector.broadcast %cst_15 : f32 to vector<8x1xf32>
    %49 = vector.extract_strided_slice %2 {offsets = [0, 0], sizes = [8, 1], strides = [1, 1]} : vector<8x4xi32> to vector<8x1xi32>
    %50 = vector.broadcast %49 : vector<8x1xi32> to vector<8x32xi32>
    %51 = arith.cmpi eq, %50, %4 : vector<8x32xi32>
    %52 = arith.extui %51 : vector<8x32xi1> to vector<8x32xi32>
    %53 = arith.sitofp %52 : vector<8x32xi32> to vector<8x32xf32>
    %cst_16 = arith.constant dense<0.000000e+00> : vector<8x32xf32>
    %54 = tpu.matmul %53, %0, %cst_16 {dimension_numbers = #tpu.dot_dimension_numbers<[1], [0], [0], [1], [0, 0, 1, 1], [], []>} : vector<8x32xf32>, vector<32x32xf32>, vector<8x32xf32> -> vector<8x32xf32>
    %55 = arith.mulf %54, %54 : vector<8x32xf32>
    %cst_17 = arith.constant dense<0.000000e+00> : vector<8xf32>
    %56 = vector.multi_reduction <add>, %55, %cst_17 [1] : vector<8x32xf32> to vector<8xf32>
    %57 = vector.shape_cast %56 : vector<8xf32> to vector<8x1xf32>
    %cst_18 = arith.constant 1.000000e-24 : f32
    %58 = vector.broadcast %cst_18 : f32 to vector<8x1xf32>
    %59 = arith.maximumf %57, %58 : vector<8x1xf32>
    %60 = math.rsqrt %59 : vector<8x1xf32>
    %61 = vector.broadcast %60 : vector<8x1xf32> to vector<8x32xf32>
    %62 = arith.mulf %54, %61 : vector<8x32xf32>
    %63 = vector.extract_strided_slice %3 {offsets = [0, 0], sizes = [8, 1], strides = [1, 1]} : vector<8x4xi32> to vector<8x1xi32>
    %64 = vector.broadcast %63 : vector<8x1xi32> to vector<8x32xi32>
    %65 = arith.cmpi eq, %64, %4 : vector<8x32xi32>
    %66 = arith.extui %65 : vector<8x32xi1> to vector<8x32xi32>
    %67 = arith.sitofp %66 : vector<8x32xi32> to vector<8x32xf32>
    %cst_19 = arith.constant dense<0.000000e+00> : vector<8x32xf32>
    %68 = tpu.matmul %67, %0, %cst_19 {dimension_numbers = #tpu.dot_dimension_numbers<[1], [0], [0], [1], [0, 0, 1, 1], [], []>} : vector<8x32xf32>, vector<32x32xf32>, vector<8x32xf32> -> vector<8x32xf32>
    %69 = arith.mulf %68, %68 : vector<8x32xf32>
    %cst_20 = arith.constant dense<0.000000e+00> : vector<8xf32>
    %70 = vector.multi_reduction <add>, %69, %cst_20 [1] : vector<8x32xf32> to vector<8xf32>
    %71 = vector.shape_cast %70 : vector<8xf32> to vector<8x1xf32>
    %cst_21 = arith.constant 1.000000e-24 : f32
    %72 = vector.broadcast %cst_21 : f32 to vector<8x1xf32>
    %73 = arith.maximumf %71, %72 : vector<8x1xf32>
    %74 = math.rsqrt %73 : vector<8x1xf32>
    %75 = vector.broadcast %74 : vector<8x1xf32> to vector<8x32xf32>
    %76 = arith.mulf %68, %75 : vector<8x32xf32>
    %77 = arith.addf %62, %1 : vector<8x32xf32>
    %78 = arith.subf %77, %76 : vector<8x32xf32>
    %79 = math.absf %78 : vector<8x32xf32>
    %cst_22 = arith.constant dense<0.000000e+00> : vector<8xf32>
    %80 = vector.multi_reduction <add>, %79, %cst_22 [1] : vector<8x32xf32> to vector<8xf32>
    %81 = vector.shape_cast %80 : vector<8xf32> to vector<8x1xf32>
    %cst_23 = arith.constant 0.000000e+00 : f32
    %82 = vector.broadcast %cst_23 : f32 to vector<8x1xf32>
    %83 = arith.subf %82, %81 : vector<8x1xf32>
    %cst_24 = arith.constant 1.000000e+00 : f32
    %84 = vector.broadcast %cst_24 : f32 to vector<8x1xf32>
    %85 = arith.subf %84, %47 : vector<8x1xf32>
    %86 = arith.addf %85, %83 : vector<8x1xf32>
    %cst_25 = arith.constant 0.000000e+00 : f32
    %87 = vector.broadcast %cst_25 : f32 to vector<8x1xf32>
    %88 = arith.maximumf %86, %87 : vector<8x1xf32>
    %89 = arith.addf %48, %88 : vector<8x1xf32>
    %90 = vector.extract_strided_slice %2 {offsets = [0, 1], sizes = [8, 1], strides = [1, 1]} : vector<8x4xi32> to vector<8x1xi32>
    %91 = vector.broadcast %90 : vector<8x1xi32> to vector<8x32xi32>
    %92 = arith.cmpi eq, %91, %4 : vector<8x32xi32>
    %93 = arith.extui %92 : vector<8x32xi1> to vector<8x32xi32>
    %94 = arith.sitofp %93 : vector<8x32xi32> to vector<8x32xf32>
    %cst_26 = arith.constant dense<0.000000e+00> : vector<8x32xf32>
    %95 = tpu.matmul %94, %0, %cst_26 {dimension_numbers = #tpu.dot_dimension_numbers<[1], [0], [0], [1], [0, 0, 1, 1], [], []>} : vector<8x32xf32>, vector<32x32xf32>, vector<8x32xf32> -> vector<8x32xf32>
    %96 = arith.mulf %95, %95 : vector<8x32xf32>
    %cst_27 = arith.constant dense<0.000000e+00> : vector<8xf32>
    %97 = vector.multi_reduction <add>, %96, %cst_27 [1] : vector<8x32xf32> to vector<8xf32>
    %98 = vector.shape_cast %97 : vector<8xf32> to vector<8x1xf32>
    %cst_28 = arith.constant 1.000000e-24 : f32
    %99 = vector.broadcast %cst_28 : f32 to vector<8x1xf32>
    %100 = arith.maximumf %98, %99 : vector<8x1xf32>
    %101 = math.rsqrt %100 : vector<8x1xf32>
    %102 = vector.broadcast %101 : vector<8x1xf32> to vector<8x32xf32>
    %103 = arith.mulf %95, %102 : vector<8x32xf32>
    %104 = vector.extract_strided_slice %3 {offsets = [0, 1], sizes = [8, 1], strides = [1, 1]} : vector<8x4xi32> to vector<8x1xi32>
    %105 = vector.broadcast %104 : vector<8x1xi32> to vector<8x32xi32>
    %106 = arith.cmpi eq, %105, %4 : vector<8x32xi32>
    %107 = arith.extui %106 : vector<8x32xi1> to vector<8x32xi32>
    %108 = arith.sitofp %107 : vector<8x32xi32> to vector<8x32xf32>
    %cst_29 = arith.constant dense<0.000000e+00> : vector<8x32xf32>
    %109 = tpu.matmul %108, %0, %cst_29 {dimension_numbers = #tpu.dot_dimension_numbers<[1], [0], [0], [1], [0, 0, 1, 1], [], []>} : vector<8x32xf32>, vector<32x32xf32>, vector<8x32xf32> -> vector<8x32xf32>
    %110 = arith.mulf %109, %109 : vector<8x32xf32>
    %cst_30 = arith.constant dense<0.000000e+00> : vector<8xf32>
    %111 = vector.multi_reduction <add>, %110, %cst_30 [1] : vector<8x32xf32> to vector<8xf32>
    %112 = vector.shape_cast %111 : vector<8xf32> to vector<8x1xf32>
    %cst_31 = arith.constant 1.000000e-24 : f32
    %113 = vector.broadcast %cst_31 : f32 to vector<8x1xf32>
    %114 = arith.maximumf %112, %113 : vector<8x1xf32>
    %115 = math.rsqrt %114 : vector<8x1xf32>
    %116 = vector.broadcast %115 : vector<8x1xf32> to vector<8x32xf32>
    %117 = arith.mulf %109, %116 : vector<8x32xf32>
    %118 = arith.addf %103, %1 : vector<8x32xf32>
    %119 = arith.subf %118, %117 : vector<8x32xf32>
    %120 = math.absf %119 : vector<8x32xf32>
    %cst_32 = arith.constant dense<0.000000e+00> : vector<8xf32>
    %121 = vector.multi_reduction <add>, %120, %cst_32 [1] : vector<8x32xf32> to vector<8xf32>
    %122 = vector.shape_cast %121 : vector<8xf32> to vector<8x1xf32>
    %cst_33 = arith.constant 0.000000e+00 : f32
    %123 = vector.broadcast %cst_33 : f32 to vector<8x1xf32>
    %124 = arith.subf %123, %122 : vector<8x1xf32>
    %cst_34 = arith.constant 1.000000e+00 : f32
    %125 = vector.broadcast %cst_34 : f32 to vector<8x1xf32>
    %126 = arith.subf %125, %47 : vector<8x1xf32>
    %127 = arith.addf %126, %124 : vector<8x1xf32>
    %cst_35 = arith.constant 0.000000e+00 : f32
    %128 = vector.broadcast %cst_35 : f32 to vector<8x1xf32>
    %129 = arith.maximumf %127, %128 : vector<8x1xf32>
    %130 = arith.addf %89, %129 : vector<8x1xf32>
    %131 = vector.extract_strided_slice %2 {offsets = [0, 2], sizes = [8, 1], strides = [1, 1]} : vector<8x4xi32> to vector<8x1xi32>
    %132 = vector.broadcast %131 : vector<8x1xi32> to vector<8x32xi32>
    %133 = arith.cmpi eq, %132, %4 : vector<8x32xi32>
    %134 = arith.extui %133 : vector<8x32xi1> to vector<8x32xi32>
    %135 = arith.sitofp %134 : vector<8x32xi32> to vector<8x32xf32>
    %cst_36 = arith.constant dense<0.000000e+00> : vector<8x32xf32>
    %136 = tpu.matmul %135, %0, %cst_36 {dimension_numbers = #tpu.dot_dimension_numbers<[1], [0], [0], [1], [0, 0, 1, 1], [], []>} : vector<8x32xf32>, vector<32x32xf32>, vector<8x32xf32> -> vector<8x32xf32>
    %137 = arith.mulf %136, %136 : vector<8x32xf32>
    %cst_37 = arith.constant dense<0.000000e+00> : vector<8xf32>
    %138 = vector.multi_reduction <add>, %137, %cst_37 [1] : vector<8x32xf32> to vector<8xf32>
    %139 = vector.shape_cast %138 : vector<8xf32> to vector<8x1xf32>
    %cst_38 = arith.constant 1.000000e-24 : f32
    %140 = vector.broadcast %cst_38 : f32 to vector<8x1xf32>
    %141 = arith.maximumf %139, %140 : vector<8x1xf32>
    %142 = math.rsqrt %141 : vector<8x1xf32>
    %143 = vector.broadcast %142 : vector<8x1xf32> to vector<8x32xf32>
    %144 = arith.mulf %136, %143 : vector<8x32xf32>
    %145 = vector.extract_strided_slice %3 {offsets = [0, 2], sizes = [8, 1], strides = [1, 1]} : vector<8x4xi32> to vector<8x1xi32>
    %146 = vector.broadcast %145 : vector<8x1xi32> to vector<8x32xi32>
    %147 = arith.cmpi eq, %146, %4 : vector<8x32xi32>
    %148 = arith.extui %147 : vector<8x32xi1> to vector<8x32xi32>
    %149 = arith.sitofp %148 : vector<8x32xi32> to vector<8x32xf32>
    %cst_39 = arith.constant dense<0.000000e+00> : vector<8x32xf32>
    %150 = tpu.matmul %149, %0, %cst_39 {dimension_numbers = #tpu.dot_dimension_numbers<[1], [0], [0], [1], [0, 0, 1, 1], [], []>} : vector<8x32xf32>, vector<32x32xf32>, vector<8x32xf32> -> vector<8x32xf32>
    %151 = arith.mulf %150, %150 : vector<8x32xf32>
    %cst_40 = arith.constant dense<0.000000e+00> : vector<8xf32>
    %152 = vector.multi_reduction <add>, %151, %cst_40 [1] : vector<8x32xf32> to vector<8xf32>
    %153 = vector.shape_cast %152 : vector<8xf32> to vector<8x1xf32>
    %cst_41 = arith.constant 1.000000e-24 : f32
    %154 = vector.broadcast %cst_41 : f32 to vector<8x1xf32>
    %155 = arith.maximumf %153, %154 : vector<8x1xf32>
    %156 = math.rsqrt %155 : vector<8x1xf32>
    %157 = vector.broadcast %156 : vector<8x1xf32> to vector<8x32xf32>
    %158 = arith.mulf %150, %157 : vector<8x32xf32>
    %159 = arith.addf %144, %1 : vector<8x32xf32>
    %160 = arith.subf %159, %158 : vector<8x32xf32>
    %161 = math.absf %160 : vector<8x32xf32>
    %cst_42 = arith.constant dense<0.000000e+00> : vector<8xf32>
    %162 = vector.multi_reduction <add>, %161, %cst_42 [1] : vector<8x32xf32> to vector<8xf32>
    %163 = vector.shape_cast %162 : vector<8xf32> to vector<8x1xf32>
    %cst_43 = arith.constant 0.000000e+00 : f32
    %164 = vector.broadcast %cst_43 : f32 to vector<8x1xf32>
    %165 = arith.subf %164, %163 : vector<8x1xf32>
    %cst_44 = arith.constant 1.000000e+00 : f32
    %166 = vector.broadcast %cst_44 : f32 to vector<8x1xf32>
    %167 = arith.subf %166, %47 : vector<8x1xf32>
    %168 = arith.addf %167, %165 : vector<8x1xf32>
    %cst_45 = arith.constant 0.000000e+00 : f32
    %169 = vector.broadcast %cst_45 : f32 to vector<8x1xf32>
    %170 = arith.maximumf %168, %169 : vector<8x1xf32>
    %171 = arith.addf %130, %170 : vector<8x1xf32>
    %172 = vector.extract_strided_slice %2 {offsets = [0, 3], sizes = [8, 1], strides = [1, 1]} : vector<8x4xi32> to vector<8x1xi32>
    %173 = vector.broadcast %172 : vector<8x1xi32> to vector<8x32xi32>
    %174 = arith.cmpi eq, %173, %4 : vector<8x32xi32>
    %175 = arith.extui %174 : vector<8x32xi1> to vector<8x32xi32>
    %176 = arith.sitofp %175 : vector<8x32xi32> to vector<8x32xf32>
    %cst_46 = arith.constant dense<0.000000e+00> : vector<8x32xf32>
    %177 = tpu.matmul %176, %0, %cst_46 {dimension_numbers = #tpu.dot_dimension_numbers<[1], [0], [0], [1], [0, 0, 1, 1], [], []>} : vector<8x32xf32>, vector<32x32xf32>, vector<8x32xf32> -> vector<8x32xf32>
    %178 = arith.mulf %177, %177 : vector<8x32xf32>
    %cst_47 = arith.constant dense<0.000000e+00> : vector<8xf32>
    %179 = vector.multi_reduction <add>, %178, %cst_47 [1] : vector<8x32xf32> to vector<8xf32>
    %180 = vector.shape_cast %179 : vector<8xf32> to vector<8x1xf32>
    %cst_48 = arith.constant 1.000000e-24 : f32
    %181 = vector.broadcast %cst_48 : f32 to vector<8x1xf32>
    %182 = arith.maximumf %180, %181 : vector<8x1xf32>
    %183 = math.rsqrt %182 : vector<8x1xf32>
    %184 = vector.broadcast %183 : vector<8x1xf32> to vector<8x32xf32>
    %185 = arith.mulf %177, %184 : vector<8x32xf32>
    %186 = vector.extract_strided_slice %3 {offsets = [0, 3], sizes = [8, 1], strides = [1, 1]} : vector<8x4xi32> to vector<8x1xi32>
    %187 = vector.broadcast %186 : vector<8x1xi32> to vector<8x32xi32>
    %188 = arith.cmpi eq, %187, %4 : vector<8x32xi32>
    %189 = arith.extui %188 : vector<8x32xi1> to vector<8x32xi32>
    %190 = arith.sitofp %189 : vector<8x32xi32> to vector<8x32xf32>
    %cst_49 = arith.constant dense<0.000000e+00> : vector<8x32xf32>
    %191 = tpu.matmul %190, %0, %cst_49 {dimension_numbers = #tpu.dot_dimension_numbers<[1], [0], [0], [1], [0, 0, 1, 1], [], []>} : vector<8x32xf32>, vector<32x32xf32>, vector<8x32xf32> -> vector<8x32xf32>
    %192 = arith.mulf %191, %191 : vector<8x32xf32>
    %cst_50 = arith.constant dense<0.000000e+00> : vector<8xf32>
    %193 = vector.multi_reduction <add>, %192, %cst_50 [1] : vector<8x32xf32> to vector<8xf32>
    %194 = vector.shape_cast %193 : vector<8xf32> to vector<8x1xf32>
    %cst_51 = arith.constant 1.000000e-24 : f32
    %195 = vector.broadcast %cst_51 : f32 to vector<8x1xf32>
    %196 = arith.maximumf %194, %195 : vector<8x1xf32>
    %197 = math.rsqrt %196 : vector<8x1xf32>
    %198 = vector.broadcast %197 : vector<8x1xf32> to vector<8x32xf32>
    %199 = arith.mulf %191, %198 : vector<8x32xf32>
    %200 = arith.addf %185, %1 : vector<8x32xf32>
    %201 = arith.subf %200, %199 : vector<8x32xf32>
    %202 = math.absf %201 : vector<8x32xf32>
    %cst_52 = arith.constant dense<0.000000e+00> : vector<8xf32>
    %203 = vector.multi_reduction <add>, %202, %cst_52 [1] : vector<8x32xf32> to vector<8xf32>
    %204 = vector.shape_cast %203 : vector<8xf32> to vector<8x1xf32>
    %cst_53 = arith.constant 0.000000e+00 : f32
    %205 = vector.broadcast %cst_53 : f32 to vector<8x1xf32>
    %206 = arith.subf %205, %204 : vector<8x1xf32>
    %cst_54 = arith.constant 1.000000e+00 : f32
    %207 = vector.broadcast %cst_54 : f32 to vector<8x1xf32>
    %208 = arith.subf %207, %47 : vector<8x1xf32>
    %209 = arith.addf %208, %206 : vector<8x1xf32>
    %cst_55 = arith.constant 0.000000e+00 : f32
    %210 = vector.broadcast %cst_55 : f32 to vector<8x1xf32>
    %211 = arith.maximumf %209, %210 : vector<8x1xf32>
    %212 = arith.addf %171, %211 : vector<8x1xf32>
    %213 = vector.shape_cast %212 : vector<8x1xf32> to vector<1x8x1xf32>
    %cst_56 = arith.constant dense<0.000000e+00> : vector<1xf32>
    %214 = vector.multi_reduction <add>, %213, %cst_56 [1, 2] : vector<1x8x1xf32> to vector<1xf32>
    %215 = vector.shape_cast %214 : vector<1xf32> to vector<1x1x1xf32>
    %216 = vector.extract %215[0, 0, 0] : f32 from vector<1x1x1xf32>
    %217 = arith.mulf %23, %23 : vector<8x32xf32>
    %218 = vector.shape_cast %217 : vector<8x32xf32> to vector<1x8x32xf32>
    %cst_57 = arith.constant dense<0.000000e+00> : vector<1xf32>
    %219 = vector.multi_reduction <add>, %218, %cst_57 [1, 2] : vector<1x8x32xf32> to vector<1xf32>
    %220 = vector.shape_cast %219 : vector<1xf32> to vector<1x1x1xf32>
    %221 = vector.extract %220[0, 0, 0] : f32 from vector<1x1x1xf32>
    %222 = arith.mulf %40, %40 : vector<8x32xf32>
    %223 = vector.shape_cast %222 : vector<8x32xf32> to vector<1x8x32xf32>
    %cst_58 = arith.constant dense<0.000000e+00> : vector<1xf32>
    %224 = vector.multi_reduction <add>, %223, %cst_58 [1, 2] : vector<1x8x32xf32> to vector<1xf32>
    %225 = vector.shape_cast %224 : vector<1xf32> to vector<1x1x1xf32>
    %226 = vector.extract %225[0, 0, 0] : f32 from vector<1x1x1xf32>
    %227 = arith.addf %221, %226 : f32
    %228 = arith.mulf %1, %1 : vector<8x32xf32>
    %229 = vector.shape_cast %228 : vector<8x32xf32> to vector<1x8x32xf32>
    %cst_59 = arith.constant dense<0.000000e+00> : vector<1xf32>
    %230 = vector.multi_reduction <add>, %229, %cst_59 [1, 2] : vector<1x8x32xf32> to vector<1xf32>
    %231 = vector.shape_cast %230 : vector<1xf32> to vector<1x1x1xf32>
    %232 = vector.extract %231[0, 0, 0] : f32 from vector<1x1x1xf32>
    %233 = tpu.iota {dimensions = array<i32: 1>} : vector<1x128xi32>
    %c0_i32 = arith.constant 0 : i32
    %234 = vector.broadcast %c0_i32 : i32 to vector<1x128xi32>
    %235 = arith.cmpi eq, %233, %234 : vector<1x128xi32>
    %c1_i32_60 = arith.constant 1 : i32
    %236 = vector.broadcast %c1_i32_60 : i32 to vector<1x128xi32>
    %237 = arith.cmpi eq, %233, %236 : vector<1x128xi32>
    %c2_i32_61 = arith.constant 2 : i32
    %238 = vector.broadcast %c2_i32_61 : i32 to vector<1x128xi32>
    %239 = arith.cmpi eq, %233, %238 : vector<1x128xi32>
    %cst_62 = arith.constant 0.000000e+00 : f32
    %240 = vector.broadcast %232 : f32 to vector<1x128xf32>
    %241 = vector.broadcast %cst_62 : f32 to vector<1x128xf32>
    %242 = arith.select %239, %240, %241 : vector<1x128xi1>, vector<1x128xf32>
    %243 = vector.broadcast %227 : f32 to vector<1x128xf32>
    %244 = arith.select %237, %243, %242 : vector<1x128xi1>, vector<1x128xf32>
    %245 = vector.broadcast %216 : f32 to vector<1x128xf32>
    %246 = arith.select %235, %245, %244 : vector<1x128xi1>, vector<1x128xf32>
    %247 = vector.shape_cast %246 : vector<1x128xf32> to vector<1x1x128xf32>
    %c0_63 = arith.constant 0 : index
    %c0_64 = arith.constant 0 : index
    %c0_65 = arith.constant 0 : index
    %248 = vector.load %arg5[%c0_63, %c0_64, %c0_65] : memref<1x1x128xf32, #tpu.memory_space<vmem>>, vector<1x1x128xf32>
    tpu.vector_store %arg5[%c0_63, %c0_64, %c0_65], %247 {strides = array<i32>} : memref<1x1x128xf32, #tpu.memory_space<vmem>>, vector<1x1x128xf32>,
    return
  }
  func.func @transform_0(%arg0: i32) -> (i32, i32) {
    %c0_i32 = arith.constant 0 : i32
    %c0_i32_0 = arith.constant 0 : i32
    %c0_i32_1 = arith.constant 0 : i32
    return %c0_i32, %c0_i32_0 : i32, i32
  }
  func.func @transform_1(%arg0: i32) -> (i32, i32) {
    %c0_i32 = arith.constant 0 : i32
    %c0_i32_0 = arith.constant 0 : i32
    return %arg0, %c0_i32 : i32, i32
  }
  func.func @transform_2(%arg0: i32) -> (i32, i32) {
    %c0_i32 = arith.constant 0 : i32
    %c0_i32_0 = arith.constant 0 : i32
    return %arg0, %c0_i32 : i32, i32
  }
  func.func @transform_3(%arg0: i32) -> (i32, i32) {
    %c0_i32 = arith.constant 0 : i32
    %c0_i32_0 = arith.constant 0 : i32
    return %arg0, %c0_i32 : i32, i32
  }
  func.func @transform_4(%arg0: i32) -> (i32, i32, i32) {
    %c0_i32 = arith.constant 0 : i32
    %c0_i32_0 = arith.constant 0 : i32
    %c0_i32_1 = arith.constant 0 : i32
    return %arg0, %c0_i32, %c0_i32_0 : i32, i32, i32
  }
}

</mosaic_0001>

<bundles_post_ra>
// kernel: link_prediction_loss.1
= control target key start
LH: loop header
LB: loop body
LE: loop exit
PB: predicated region body
PF: predicated region fallthrough
CT: control target
= control target key end

     0   :  { %s977_s15 = smov 0   ;;  %s1212_s0 = inlined_call_operand.vmem [shape: f32[32,32], index: 0, kind: input, shape index: {}]   ;;  %s1213_s1 = inlined_call_operand.vmem [shape: f32[16,32], index: 1, kind: input, shape index: {}]   ;;  %s1214_s2 = inlined_call_operand.vmem [shape: s32[16,4], index: 2, kind: input, shape index: {}]   ;;  %s1215_s3 = inlined_call_operand.vmem [shape: s32[16,4], index: 3, kind: input, shape index: {}]   ;;  %s1216_s4 = inlined_call_operand.vmem [shape: f32[2,1,128], index: 4, kind: output, shape index: {}]  }
   0x1 LB: > { %s860_s16 = sadd.s32 4294967295, %s945_s15   ;;  %p864_p0 = scmp.ge.s32.totalorder %s945_s15, 1  ;;  %s945_s15 = sphi %s977_s15, %s14_s15  }
   0x2   : > { %p179_p1 = scmp.lt.s32.totalorder %s945_s15, 3 }
   0x4   : > { %p180_p2 = pnand %p864_p0, %p179_p1 }
   0x5   : > { %p210_p3 = scmp.lt.s32.totalorder (!%p180_p2), %s860_s16, 1  ;;  %s868_s21 = sshll.u32 (!%p180_p2), %s860_s16, 3 }
   0x6   : > { %183 = sbr.rel (%p180_p2) target bundleno = 754 (0x2f2), region = 36 }
   0xb   : > { %v988_v0 = vld [vmem:[%s1212_s0 + $0x18] sm:$0xff]  ;;  %v993_v1 = vld [vmem:[%s1212_s0 + $0x10] sm:$0xff]  ;;  %v232_v2 = vlaneseq  ;;  %v947_v3 = vmov 1   ;;  %v1000_v4 = vld [vmem:[%s1212_s0 + $0x8] sm:$0xff]  ;;  %s1220_s16 = smov (!%p210_p3, %s860_s16), 1  ;;  %v237_v6 = vstv %s868_s21  ;;  %v948_v7 = vmov 0  }
   0xc   : > { %259 = vmatpush.msra.mxu0 %v988_v0  ;;  %302 = vmatpush.msra.mxu1 %v988_v0  ;;  %s1007_s24 = sshll.u32 %s1220_s16, 3  ;;  %v1012_v8 = vld [vmem:[%s1212_s0] sm:$0xff]  ;;  %vm243_vm0 = vcmask 261120   ;;  %v949_v15 = vmov 0.0   ;;  %v950_v18 = vmov 2   ;;  %v951_v19 = vmov 3   ;;  %s224_s19 = scalar_lea.vmem %s1216_s4, %s1220_s16 }
   0xd   : > { %915 = vset.pattern.permute.xlu2 %v947_v3  ;;  %913 = vset.pattern.permute.xlu1 %v947_v3  ;;  %v235_v5 = vshrl.u32 %v232_v2, 7  ;;  %v1014_v9 = vand.u32 127, %v232_v2  ;;  %s221_s29 = scalar_lea.vmem %s1215_s3, %s1007_s24  ;;  %s217_s6 = scalar_lea.vmem %s1214_s2, %s1007_s24 }
   0xe   : > { %260 = vmatpush.msra.mxu0 %v993_v1  ;;  %912 = vset.pattern.permute.xlu0 %v948_v7  ;;  %v231_v11 = vld [vmem:[%s221_s29] sm:$0xff]  ;;  %s213_s9 = scalar_lea.vmem %s1213_s1, %s1007_s24 }
   0xf   : > { %303 = vmatpush.msra.mxu1 %v993_v1  ;;  %v238_v10 = vadd.s32 %v237_v6, %v235_v5  ;;  %354 = vmatpush.msra.mxu2 %v988_v0  ;;  %v230_v13 = vld [vmem:[%s217_s6] sm:$0xff] }
  0x10   : > { %261 = vmatpush.msra.mxu0 %v1000_v4  ;;  %399 = vmatpush.msra.mxu3 %v988_v0 }
  0x11   : > { %304 = vmatpush.msra.mxu1 %v1000_v4  ;;  %v239_v12 = vmul.u32 2, %v238_v10  ;;  %355 = vmatpush.msra.mxu2 %v993_v1 }
  0x12   : > { %480 = vperm.xlu2 %915, %v231_v11   ;;  %262 = vmatpush.msra.mxu0 %v1012_v8 }
  0x13   : > { %435 = vperm.xlu1 %913, %v230_v13   ;;  %334 = vperm.xlu0 %912, %v230_v13   ;;  %vm240_vm1 = vcmp.eq.s32.totalorder %v239_v12, %v1014_v9  ;;  %v283_v14 = vadd.s32 1, %v239_v12 }
  0x14   : > { %v869_v16 = vsel %vm240_vm1, 1.0, %v949_v15  ;;  %305 = vmatpush.msra.mxu1 %v1012_v8  ;;  %455 = vmatpush.msrb.mxu0 %v988_v0 }
  0x15   : > { %870 = vmatmul.msk.f32.vlgmr.msra.gmra.mxu0 %vm243_vm0, %v869_v16  ;;  %vm284_vm2 = vcmp.eq.s32.totalorder %v283_v14, %v1014_v9  ;;  %356 = vmatpush.msra.mxu2 %v1000_v4  ;;  %v1139_v14 = vld [vmem:[%s213_s9] sm:$0xff] }
  0x16   : > { %500 = vmatpush.msrb.mxu1 %v988_v0  ;;  %v871_v17 = vsel %vm284_vm2, 1.0, %v949_v15  ;;  %456 = vmatpush.msrb.mxu0 %v993_v1 }
  0x17   : > { %872 = vmatmul.msk.f32.vlgmr.msra.gmra.mxu1 %vm243_vm0, %v871_v17  ;;  %400 = vmatpush.msra.mxu3 %v993_v1 }
  0x18   : > { %501 = vmatpush.msrb.mxu1 %v993_v1  ;;  %457 = vmatpush.msrb.mxu0 %v1000_v4 }
  0x19   : > { %357 = vmatpush.msra.mxu2 %v1012_v8  ;;  %401 = vmatpush.msra.mxu3 %v1000_v4 }
  0x1a   : > { %916 = vset.pattern.permute.xlu2 %v950_v18  ;;  %502 = vmatpush.msrb.mxu1 %v1000_v4 }
  0x1b   : > { %379 = vperm.xlu0 %912, %v231_v11   ;;  %914 = vset.pattern.permute.xlu1 %v950_v18 }
  0x1c   : > { %535 = vperm.xlu1 %914, %v230_v13   ;;  %580 = vperm.xlu2 %916, %v231_v11  }
  0x1d   : > { %503 = vmatpush.msrb.mxu1 %v1012_v8  ;;  %458 = vmatpush.msrb.mxu0 %v1012_v8 }
  0x1e   : > { %402 = vmatpush.msra.mxu3 %v1012_v8  ;;  %555 = vmatpush.msrb.mxu2 %v988_v0 }
  0x1f   : > { %655 = vmatpush.msra.mxu0 %v988_v0  ;;  %700 = vmatpush.msra.mxu1 %v988_v0 }
  0x20   : > { %600 = vmatpush.msrb.mxu3 %v988_v0  ;;  %556 = vmatpush.msrb.mxu2 %v993_v1 }
  0x21   : > { %656 = vmatpush.msra.mxu0 %v993_v1  ;;  %701 = vmatpush.msra.mxu1 %v993_v1 }
  0x22   : > { %601 = vmatpush.msrb.mxu3 %v993_v1  ;;  %557 = vmatpush.msrb.mxu2 %v1000_v4 }
  0x23   : > { %917 = vset.pattern.permute.xlu0 %v951_v19  ;;  %657 = vmatpush.msra.mxu0 %v1000_v4 }
  0x24   : > { %602 = vmatpush.msrb.mxu3 %v1000_v4  ;;  %635 = vperm.xlu0 %917, %v230_v13  }
  0x25   : > { %918 = vset.pattern.permute.xlu1 %v951_v19  ;;  %558 = vmatpush.msrb.mxu2 %v1012_v8 }
  0x26   : > { %680 = vperm.xlu1 %918, %v231_v11   ;;  %603 = vmatpush.msrb.mxu3 %v1012_v8 }
  0x27   : > { %702 = vmatpush.msra.mxu1 %v1000_v4  ;;  %658 = vmatpush.msra.mxu0 %v1012_v8 }
  0x29   : > { %703 = vmatpush.msra.mxu1 %v1012_v8 }
  0x6c   : > { %v481_v20 = vpop.permute.xlu2 %480 }
  0x6d   : > { %vm482_vm3 = vcmp.eq.s32.totalorder %v481_v20, %v1014_v9 }
  0x6e   : > { %v879_v21 = vsel %vm482_vm3, 1.0, %v949_v15 }
  0x6f   : > { %880 = vmatmul.msk.f32.vlgmr.msrb.gmra.mxu1 %vm243_vm0, %v879_v21 }
  0x76   : > { %v581_v29 = vpop.permute.xlu2 %580 }
  0x77   : > { %vm582_vm8 = vcmp.eq.s32.totalorder %v581_v29, %v1014_v9 }
  0x78   : > { %v883_v35 = vsel %vm582_vm8, 1.0, %v949_v15 }
  0x85   : > { %v436_v22 = vpop.permute.xlu1 %435  ;;  %v335_v23 = vpop.permute.xlu0 %334 }
  0x86   : > { %vm437_vm4 = vcmp.eq.s32.totalorder %v436_v22, %v1014_v9  ;;  %vm336_vm5 = vcmp.eq.s32.totalorder %v335_v23, %v1014_v9 }
  0x87   : > { %v877_v24 = vsel %vm437_vm4, 1.0, %v949_v15  ;;  %v873_v25 = vsel %vm336_vm5, 1.0, %v949_v15 }
  0x88   : > { %874 = vmatmul.msk.f32.vlgmr.msra.gmra.mxu2 %vm243_vm0, %v873_v25  ;;  %878 = vmatmul.msk.f32.vlgmr.msrb.gmra.mxu0 %vm243_vm0, %v877_v24 }
  0x8d   : > { %v380_v26 = vpop.permute.xlu0 %379 }
  0x8e   : > { %vm381_vm6 = vcmp.eq.s32.totalorder %v380_v26, %v1014_v9  ;;  %v536_v27 = vpop.permute.xlu1 %535 }
  0x8f   : > { %v875_v28 = vsel %vm381_vm6, 1.0, %v949_v15  ;;  %vm537_vm7 = vcmp.eq.s32.totalorder %v536_v27, %v1014_v9 }
  0x90   : > { %876 = vmatmul.msk.f32.vlgmr.msra.gmra.mxu3 %vm243_vm0, %v875_v28  ;;  %v881_v30 = vsel %vm537_vm7, 1.0, %v949_v15 }
  0x91   : > { %882 = vmatmul.msk.f32.vlgmr.msrb.gmra.mxu2 %vm243_vm0, %v881_v30 }
  0x92   : > { %v1081_v31 = vpop.f32.mrf.mxu0 }
  0x93   : > { %v267_v32 = vmul.f32 %v1081_v31, %v1081_v31 }
  0x94   : > { %v1086_v33 = vpop.f32.mrf.mxu1 }
  0x95   : > { %v310_v34 = vmul.f32 %v1086_v33, %v1086_v33  ;;  %v268_v36 = vsel %vm243_vm0, %v267_v32, 0.0 }
  0x96   : > { %v636_v37 = vpop.permute.xlu0 %635  ;;  %269 = vadd.xlane.f32.xlu2 %v268_v36 }
  0x97   : > { %vm637_vm9 = vcmp.eq.s32.totalorder %v636_v37, %v1014_v9  ;;  %v311_v38 = vsel %vm243_vm0, %v310_v34, 0.0 }
  0x98   : > { %v681_v39 = vpop.permute.xlu1 %680  ;;  %v885_v40 = vsel %vm637_vm9, 1.0, %v949_v15  ;;  %884 = vmatmul.msk.f32.vlgmr.msrb.gmra.mxu3 %vm243_vm0, %v883_v35  ;;  %312 = vadd.xlane.f32.xlu1 %v311_v38 }
  0x99   : > { %vm682_vm10 = vcmp.eq.s32.totalorder %v681_v39, %v1014_v9  ;;  %886 = vmatmul.msk.f32.vlgmr.msra.gmra.mxu0 %vm243_vm0, %v885_v40 }
  0x9a   : > { %v887_v41 = vsel %vm682_vm10, 1.0, %v949_v15 }
  0x9b   : > { %888 = vmatmul.msk.f32.vlgmr.msra.gmra.mxu1 %vm243_vm0, %v887_v41 }
  0xec   : > { %v1100_v42 = vpop.f32.mrf.mxu1 }
  0xed   : > { %v508_v43 = vmul.f32 %v1100_v42, %v1100_v42 }
  0xef   : > { %v509_v44 = vsel %vm243_vm0, %v508_v43, 0.0 }
  0xf0   : > { %510 = vadd.xlane.f32.xlu1 %v509_v44 }
 0x105   : > { %v1105_v45 = vpop.f32.mrf.mxu0 }
 0x106   : > { %v463_v46 = vmul.f32 %v1105_v45, %v1105_v45 }
 0x108   : > { %v464_v47 = vsel %vm243_vm0, %v463_v46, 0.0 }
 0x109   : > { %465 = vadd.xlane.f32.xlu2 %v464_v47  ;;  %v270_v48 = vpop.xlane.xlu2 %269 }
 0x10a   : > { %v271_v49 = vmax.f32 %v270_v48, 1e-24 }
 0x10b   : > { %v1110_v50 = vpop.f32.mrf.mxu2  ;;  %v313_v51 = vpop.xlane.xlu1 %312 }
 0x10c   : > { %919 = vrsqrt.f32 %v271_v49  ;;  %v362_v52 = vmul.f32 %v1110_v50, %v1110_v50  ;;  %v314_v53 = vmax.f32 %v313_v51, 1e-24  ;;  %vm278_vm11 = vweird.f32 %v271_v49 }
 0x10e   : > { %921 = vrsqrt.f32 %v314_v53  ;;  %v363_v54 = vsel %vm243_vm0, %v362_v52, 0.0  ;;  %vm321_vm13 = vweird.f32 %v314_v53 }
 0x10f   : > { %364 = vadd.xlane.f32.xlu0 %v363_v54 }
 0x112   : > { %v920_v55 = vpop.eup %919 }
 0x113   : > { %v273_v56 = vmul.f32 %v920_v55, %v271_v49  ;;  %v1115_v57 = vpop.f32.mrf.mxu3  ;;  %vm279_vm12 = vweird.f32 %v920_v55 }
 0x114   : > { %v922_v58 = vpop.eup %921  ;;  %v407_v59 = vmul.f32 %v1115_v57, %v1115_v57  ;;  %v1119_v62 = vpop.f32.mrf.mxu2  ;;  %vm280_vm15 = vmor %vm278_vm11, %vm279_vm12 }
 0x115   : > { %v274_v60 = vmul.f32 %v920_v55, %v273_v56  ;;  %v316_v61 = vmul.f32 %v922_v58, %v314_v53  ;;  %v563_v4 = vmul.f32 %v1119_v62, %v1119_v62  ;;  %vm322_vm14 = vweird.f32 %v922_v58 }
 0x116   : > { %v1121_v63 = vpop.f32.mrf.mxu0  ;;  %v408_v0 = vsel %vm243_vm0, %v407_v59, 0.0  ;;  %vm323_vm1 = vmor %vm321_vm13, %vm322_vm14 }
 0x117   : > { %v275_v1 = vmul.f32 0.5, %v274_v60  ;;  %v317_v2 = vmul.f32 %v922_v58, %v316_v61  ;;  %v663_v3 = vmul.f32 %v1121_v63, %v1121_v63  ;;  %409 = vadd.xlane.f32.xlu2 %v408_v0  ;;  %v564_v13 = vsel %vm243_vm0, %v563_v4, 0.0 }
 0x118   : > { %v1141_v16 = vpop.f32.mrf.mxu1 }
 0x119   : > { %v276_v5 = vsub.f32 1.5, %v275_v1  ;;  %v318_v6 = vmul.f32 0.5, %v317_v2  ;;  %v664_v7 = vsel %vm243_vm0, %v663_v3, 0.0  ;;  %v708_v21 = vmul.f32 %v1141_v16, %v1141_v16 }
 0x11a   : > { %665 = vadd.xlane.f32.xlu1 %v664_v7 }
 0x11b   : > { %v277_v8 = vmul.f32 %v920_v55, %v276_v5  ;;  %v319_v10 = vsub.f32 1.5, %v318_v6  ;;  %v1134_v11 = vpop.f32.mrf.mxu3  ;;  %v709_v25 = vsel %vm243_vm0, %v708_v21, 0.0 }
 0x11c   : > { %v608_v12 = vmul.f32 %v1134_v11, %v1134_v11 }
 0x11d   : > { %v320_v15 = vmul.f32 %v922_v58, %v319_v10  ;;  %v281_v17 = vsel %vm280_vm15, %v920_v55, %v277_v8 }
 0x11e   : > { %v609_v18 = vsel %vm243_vm0, %v608_v12, 0.0  ;;  %v1145_v19 = vmul.f32 %v281_v17, %v1081_v31 }
 0x11f   : > { %610 = vadd.xlane.f32.xlu0 %v609_v18  ;;  %565 = vadd.xlane.f32.xlu2 %v564_v13  ;;  %v324_v20 = vsel %vm323_vm1, %v922_v58, %v320_v15 }
 0x120   : > { %v1150_v22 = vmul.f32 %v324_v20, %v1086_v33  ;;  %v326_v23 = vadd.f32 %v1145_v19, %v1139_v14 }
 0x122   : > { %v327_v24 = vsub.f32 %v326_v23, %v1150_v22 }
 0x124   : > { %v328_v26 = vand.u32 2147483647, %v327_v24 }
 0x126   : > { %v329_v27 = vsel %vm243_vm0, %v328_v26, 0.0 }
 0x127   : > { %710 = vadd.xlane.f32.xlu2 %v709_v25  ;;  %330 = vadd.xlane.f32.xlu0 %v329_v27 }
 0x163   : > { %v511_v28 = vpop.xlane.xlu1 %510 }
 0x164   : > { %v512_v29 = vmax.f32 %v511_v28, 1e-24 }
 0x166   : > { %923 = vrsqrt.f32 %v512_v29  ;;  %vm519_vm2 = vweird.f32 %v512_v29 }
 0x16c   : > { %v924_v30 = vpop.eup %923 }
 0x16d   : > { %v514_v31 = vmul.f32 %v924_v30, %v512_v29  ;;  %vm520_vm3 = vweird.f32 %v924_v30 }
 0x16e   : > { %vm1157_vm6 = vmor %vm519_vm2, %vm520_vm3 }
 0x16f   : > { %v515_v34 = vmul.f32 %v924_v30, %v514_v31 }
 0x171   : > { %v516_v36 = vmul.f32 0.5, %v515_v34 }
 0x173   : > { %v517_v40 = vsub.f32 1.5, %v516_v36 }
 0x175   : > { %v518_v47 = vmul.f32 %v924_v30, %v517_v40 }
 0x177   : > { %v522_v60 = vsel %vm1157_vm6, %v924_v30, %v518_v47 }
 0x178   : > { %v523_v6 = vmul.f32 %v522_v60, %v1100_v42 }
 0x17c   : > { %v466_v32 = vpop.xlane.xlu2 %465 }
 0x17d   : > { %v467_v33 = vmax.f32 %v466_v32, 1e-24 }
 0x17f   : > { %925 = vrsqrt.f32 %v467_v33  ;;  %vm474_vm4 = vweird.f32 %v467_v33 }
 0x182   : > { %v365_v35 = vpop.xlane.xlu0 %364 }
 0x183   : > { %v366_v37 = vmax.f32 %v365_v35, 1e-24 }
 0x185   : > { %v926_v38 = vpop.eup %925  ;;  %927 = vrsqrt.f32 %v366_v37  ;;  %vm373_vm9 = vweird.f32 %v366_v37 }
 0x186   : > { %v469_v39 = vmul.f32 %v926_v38, %v467_v33  ;;  %vm475_vm5 = vweird.f32 %v926_v38 }
 0x187   : > { %vm476_vm7 = vmor %vm474_vm4, %vm475_vm5 }
 0x188   : > { %v470_v41 = vmul.f32 %v926_v38, %v469_v39 }
 0x18a   : > { %v471_v43 = vmul.f32 0.5, %v470_v41  ;;  %v410_v44 = vpop.xlane.xlu2 %409 }
 0x18b   : > { %v928_v46 = vpop.eup %927  ;;  %v411_v48 = vmax.f32 %v410_v44, 1e-24 }
 0x18c   : > { %v472_v49 = vsub.f32 1.5, %v471_v43  ;;  %v368_v51 = vmul.f32 %v928_v46, %v366_v37  ;;  %vm374_vm8 = vweird.f32 %v928_v46 }
 0x18d   : > { %929 = vrsqrt.f32 %v411_v48  ;;  %v666_v53 = vpop.xlane.xlu1 %665  ;;  %vm375_vm10 = vmor %vm373_vm9, %vm374_vm8  ;;  %vm418_vm12 = vweird.f32 %v411_v48 }
 0x18e   : > { %v473_v54 = vmul.f32 %v926_v38, %v472_v49  ;;  %v369_v55 = vmul.f32 %v928_v46, %v368_v51  ;;  %v1161_v56 = vmax.f32 %v666_v53, 1e-24 }
 0x190   : > { %v370_v58 = vmul.f32 0.5, %v369_v55  ;;  %931 = vrsqrt.f32 %v1161_v56  ;;  %v477_v59 = vsel %vm476_vm7, %v926_v38, %v473_v54  ;;  %vm674_vm14 = vweird.f32 %v1161_v56 }
 0x191   : > { %v478_v61 = vmul.f32 %v477_v59, %v1105_v45 }
 0x192   : > { %v371_v0 = vsub.f32 1.5, %v370_v58  ;;  %v566_v1 = vpop.xlane.xlu2 %565  ;;  %v611_v2 = vpop.xlane.xlu0 %610 }
 0x193   : > { %v930_v3 = vpop.eup %929  ;;  %v567_v4 = vmax.f32 %v566_v1, 1e-24  ;;  %v612_v5 = vmax.f32 %v611_v2, 1e-24  ;;  %v524_v7 = vadd.f32 %v478_v61, %v1139_v14 }
 0x194   : > { %v372_v8 = vmul.f32 %v928_v46, %v371_v0  ;;  %v413_v10 = vmul.f32 %v930_v3, %v411_v48  ;;  %vm419_vm11 = vweird.f32 %v930_v3 }
 0x195   : > { %933 = vrsqrt.f32 %v567_v4  ;;  %v525_v12 = vsub.f32 %v524_v7, %v523_v6  ;;  %vm420_vm13 = vmor %vm418_vm12, %vm419_vm11  ;;  %vm574_vm15 = vweird.f32 %v567_v4  ;;  %vm619_vm2 = vweird.f32 %v612_v5 }
 0x196   : > { %v1169_v13 = vpop.eup %931  ;;  %v414_v15 = vmul.f32 %v930_v3, %v413_v10  ;;  %935 = vrsqrt.f32 %v612_v5  ;;  %v376_v20 = vsel %vm375_vm10, %v928_v46, %v372_v8  ;;  %v745_v8 = vmul.f32 %v1145_v19, %v1145_v19 }
 0x197   : > { %v669_v45 = vmul.f32 %v1169_v13, %v1161_v56  ;;  %v526_v17 = vand.u32 2147483647, %v525_v12  ;;  %v377_v27 = vmul.f32 %v376_v20, %v1110_v50  ;;  %vm675_vm4 = vweird.f32 %v1169_v13 }
 0x198   : > { %v415_v18 = vmul.f32 0.5, %v414_v15  ;;  %vm676_vm7 = vmor %vm674_vm14, %vm675_vm4  ;;  %v756_v12 = vmul.f32 %v1150_v22, %v1150_v22  ;;  %vm734_vm11 = vcmask 7168   ;;  %vm780_vm12 = vcmp.eq.s32.totalorder %v1014_v9, 1 }
 0x199   : > { %v670_v42 = vmul.f32 %v1169_v13, %v669_v45  ;;  %v527_v21 = vsel %vm243_vm0, %v526_v17, 0.0  ;;  %v423_v37 = vadd.f32 %v377_v27, %v1139_v14 }
 0x19a   : > { %v416_v23 = vsub.f32 1.5, %v415_v18  ;;  %v711_v24 = vpop.xlane.xlu2 %710  ;;  %528 = vadd.xlane.f32.xlu2 %v527_v21 }
 0x19b   : > { %v934_v25 = vpop.eup %933  ;;  %v712_v26 = vmax.f32 %v711_v24, 1e-24  ;;  %v671_v30 = vmul.f32 0.5, %v670_v42 }
 0x19c   : > { %v936_v28 = vpop.eup %935  ;;  %v417_v29 = vmul.f32 %v930_v3, %v416_v23  ;;  %v569_v31 = vmul.f32 %v934_v25, %v567_v4  ;;  %vm575_vm1 = vweird.f32 %v934_v25 }
 0x19d   : > { %v614_v32 = vmul.f32 %v936_v28, %v612_v5  ;;  %937 = vrsqrt.f32 %v712_v26  ;;  %v672_v38 = vsub.f32 1.5, %v671_v30  ;;  %vm620_vm3 = vweird.f32 %v936_v28  ;;  %vm576_vm5 = vmor %vm574_vm15, %vm575_vm1 }
 0x19e   : > { %v570_v33 = vmul.f32 %v934_v25, %v569_v31  ;;  %v421_v34 = vsel %vm420_vm13, %v930_v3, %v417_v29  ;;  %vm621_vm6 = vmor %vm619_vm2, %vm620_vm3  ;;  %vm719_vm9 = vweird.f32 %v712_v26  ;;  %vm779_vm13 = vcmp.eq.s32.totalorder %v1014_v9, 0 }
 0x19f   : > { %v615_v35 = vmul.f32 %v936_v28, %v614_v32  ;;  %v422_v36 = vmul.f32 %v421_v34, %v1115_v57  ;;  %v673_v47 = vmul.f32 %v1169_v13, %v672_v38 }
 0x1a0   : > { %v571_v39 = vmul.f32 0.5, %v570_v33 }
 0x1a1   : > { %v616_v40 = vmul.f32 0.5, %v615_v35  ;;  %v424_v41 = vsub.f32 %v423_v37, %v422_v36  ;;  %v677_v59 = vsel %vm676_vm7, %v1169_v13, %v673_v47  ;;  %v757_v13 = vsel %vm243_vm0, %v756_v12, 0.0 }
 0x1a2   : > { %v572_v50 = vsub.f32 1.5, %v571_v39  ;;  %v678_v2 = vmul.f32 %v677_v59, %v1121_v63  ;;  %v746_v63 = vsel %vm243_vm0, %v745_v8, 0.0  ;;  %v768_v36 = vmul.f32 %v1139_v14, %v1139_v14 }
 0x1a3   : > { %v938_v43 = vpop.eup %937  ;;  %v617_v44 = vsub.f32 1.5, %v616_v40  ;;  %v425_v46 = vand.u32 2147483647, %v424_v41 }
 0x1a4   : > { %v573_v57 = vmul.f32 %v934_v25, %v572_v50  ;;  %v714_v48 = vmul.f32 %v938_v43, %v712_v26  ;;  %vm720_vm8 = vweird.f32 %v938_v43  ;;  %v724_v6 = vadd.f32 %v678_v2, %v1139_v14 }
 0x1a5   : > { %v618_v49 = vmul.f32 %v936_v28, %v617_v44  ;;  %v426_v51 = vsel %vm243_vm0, %v425_v46, 0.0  ;;  %vm721_vm10 = vmor %vm719_vm9, %vm720_vm8  ;;  %v769_v37 = vsel %vm243_vm0, %v768_v36, 0.0 }
 0x1a6   : > { %v715_v52 = vmul.f32 %v938_v43, %v714_v48  ;;  %427 = vadd.xlane.f32.xlu1 %v426_v51  ;;  %v577_v53 = vsel %vm576_vm5, %v934_v25, %v573_v57 }
 0x1a7   : > { %v578_v54 = vmul.f32 %v577_v53, %v1119_v62  ;;  %v622_v55 = vsel %vm621_vm6, %v936_v28, %v618_v49 }
 0x1a8   : > { %v716_v58 = vmul.f32 0.5, %v715_v52  ;;  %v623_v60 = vmul.f32 %v622_v55, %v1134_v11 }
 0x1a9   : > { %v624_v61 = vadd.f32 %v578_v54, %v1139_v14 }
 0x1aa   : > { %v717_v0 = vsub.f32 1.5, %v716_v58 }
 0x1ab   : > { %v625_v1 = vsub.f32 %v624_v61, %v623_v60 }
 0x1ac   : > { %v718_v3 = vmul.f32 %v938_v43, %v717_v0 }
 0x1ad   : > { %v626_v56 = vand.u32 2147483647, %v625_v1 }
 0x1ae   : > { %v722_v4 = vsel %vm721_vm10, %v938_v43, %v718_v3 }
 0x1af   : > { %v627_v62 = vsel %vm243_vm0, %v626_v56, 0.0  ;;  %v723_v5 = vmul.f32 %v722_v4, %v1141_v16  ;;  %v331_v16 = vpop.xlane.xlu0 %330 }
 0x1b0   : > { %628 = vadd.xlane.f32.xlu0 %v627_v62  ;;  %v332_v45 = vsub.f32 0.0, %v331_v16 }
 0x1b1   : > { %v725_v11 = vsub.f32 %v724_v6, %v723_v5 }
 0x1b2   : > { %v430_v20 = vsub.f32 1.0, %v332_v45 }
 0x1b3   : > { %v726_v7 = vand.u32 2147483647, %v725_v11 }
 0x1b5   : > { %v727_v10 = vsel %vm243_vm0, %v726_v7, 0.0  ;;  %vm781_vm0 = vcmp.eq.s32.totalorder %v1014_v9, 2 }
 0x1b6   : > { %728 = vadd.xlane.f32.xlu1 %v727_v10 }
 0x1b8   : > { %747 = vadd.xlane.f32.xlu0 %v746_v63 }
 0x1be   : > { %758 = vadd.xlane.f32.xlu1 %v757_v13 }
 0x20d   : > { %v529_v17 = vpop.xlane.xlu2 %528 }
 0x20e   : > { %v530_v42 = vsub.f32 0.0, %v529_v17 }
 0x210   : > { %v531_v24 = vadd.f32 %v530_v42, %v430_v20 }
 0x212   : > { %v532_v28 = vmax.f32 %v531_v24, 0.0 }
 0x219   : > { %v428_v15 = vpop.xlane.xlu1 %427 }
 0x21a   : > { %v429_v18 = vsub.f32 0.0, %v428_v15 }
 0x21c   : > { %v431_v21 = vadd.f32 %v430_v20, %v429_v18 }
 0x21e   : > { %v432_v26 = vmax.f32 %v431_v21, 0.0 }
 0x220   : > { %v533_v30 = vadd.f32 %v532_v28, %v432_v26 }
 0x223   : > { %v629_v19 = vpop.xlane.xlu0 %628 }
 0x224   : > { %v630_v23 = vsub.f32 0.0, %v629_v19 }
 0x226   : > { %v631_v25 = vadd.f32 %v630_v23, %v430_v20 }
 0x228   : > { %v632_v29 = vmax.f32 %v631_v25, 0.0 }
 0x229   : > { %v729_v27 = vpop.xlane.xlu1 %728 }
 0x22a   : > { %v730_v22 = vsub.f32 0.0, %v729_v27  ;;  %v633_v33 = vadd.f32 %v632_v29, %v533_v30 }
 0x22b   : > { %v748_v38 = vpop.xlane.xlu0 %747 }
 0x22c   : > { %v731_v31 = vadd.f32 %v730_v22, %v430_v20  ;;  %v749_v40 = vrot.slane %v748_v38, 4 }
 0x22e   : > { %v732_v32 = vmax.f32 %v731_v31, 0.0  ;;  %v750_v50 = vadd.f32 %v749_v40, %v748_v38 }
 0x230   : > { %v733_v34 = vadd.f32 %v732_v32, %v633_v33  ;;  %v751_v44 = vrot.slane %v750_v50, 2 }
 0x231   : > { %v759_v39 = vpop.xlane.xlu1 %758 }
 0x232   : > { %v735_v35 = vsel %vm734_vm11, %v733_v34, 0.0  ;;  %v760_v41 = vrot.slane %v759_v39, 4  ;;  %v752_v49 = vadd.f32 %v751_v44, %v750_v50 }
 0x233   : > { %736 = vadd.xlane.f32.xlu2 %v735_v35 }
 0x234   : > { %v761_v43 = vadd.f32 %v760_v41, %v759_v39  ;;  %v753_v14 = vrot.slane %v752_v49, 1 }
 0x236   : > { %v762_v47 = vrot.slane %v761_v43, 2  ;;  %v754_v0 = vadd.f32 %v753_v14, %v752_v49 }
 0x238   : > { %v763_v51 = vadd.f32 %v762_v47, %v761_v43 }
 0x23a   : > { %v764_v59 = vrot.slane %v763_v51, 1 }
 0x23b   : > { %770 = vadd.xlane.f32.xlu2 %v769_v37 }
 0x23c   : > { %v765_v2 = vadd.f32 %v764_v59, %v763_v51 }
 0x2a6   : > { %v737_v46 = vpop.xlane.xlu2 %736 }
 0x2a7   : > { %v738_v57 = vrot.slane %v737_v46, 4 }
 0x2a9   : > { %v739_v48 = vadd.f32 %v738_v57, %v737_v46 }
 0x2ab   : > { %v740_v52 = vrot.slane %v739_v48, 2 }
 0x2ad   : > { %v741_v53 = vadd.f32 %v740_v52, %v739_v48 }
 0x2ae   : > { %v771_v54 = vpop.xlane.xlu2 %770 }
 0x2af   : > { %v772_v55 = vrot.slane %v771_v54, 4  ;;  %v742_v58 = vrot.slane %v741_v53, 1 }
 0x2b1   : > { %v773_v60 = vadd.f32 %v772_v55, %v771_v54  ;;  %v743_v61 = vadd.f32 %v742_v58, %v741_v53 }
 0x2b3   : > { %v774_v1 = vrot.slane %v773_v60, 2  ;;  %891 = vpush %v743_v61 }
 0x2b4   : > { %893 = vpush %v754_v0 }
 0x2b5   : > { %v775_v3 = vadd.f32 %v774_v1, %v773_v60  ;;  %895 = vpush %v765_v2 }
 0x2b7   : > { %v776_v56 = vrot.slane %v775_v3, 1 }
 0x2b9   : > { %v777_v4 = vadd.f32 %v776_v56, %v775_v3 }
 0x2bb   : > { %897 = vpush %v777_v4 }
 0x2e4   : > { %s892_s10 = spop %891 }
 0x2e5   : > { %s894_s11 = spop %893  ;;  %v786_v11 = vstv %s892_s10 }
 0x2e6   : > { %s896_s12 = spop %895 }
 0x2e7   : > { %s767_s13 = sadd.f32 %s896_s12, %s894_s11 }
 0x2e9   : > { %v784_v5 = vstv %s767_s13 }
 0x2ec   : > { %s898_s14 = spop %897 }
 0x2ed   : > { %v782_v62 = vstv %s898_s14 }
 0x2ee   : > { %v783_v6 = vsel %vm781_vm0, %v782_v62, 0.0 }
 0x2ef   : > { %v785_v7 = vsel %vm780_vm12, %v784_v5, %v783_v6 }
 0x2f0   : > { %v787_v8 = vsel %vm779_vm13, %v786_v11, %v785_v7 }
 0x2f1   : > { %788 = vst [vmem:[%s224_s19] sm:$0x1] %v787_v8 }
 0x2f2 PF: > { %s14_s15 = sadd.s32 1, %s945_s15  }
 0x2f3   : > { %p11_p4 = scmp.ge.s32.totalorder %s14_s15, 4  }
 0x2f5   :  { %13 = sbr.rel (!%p11_p4) target bundleno = 1 (0x1), region = 72 }

</bundles_post_ra>
